<compile_context>
chip_gen: v7x
topology: tpu7x:2x2x1
jax: 0.10.0
libtpu: 0.0.40
codegen_flags: <defaults>
</compile_context>

<pallas_src>
import functools
import random

import numpy as np
import jax
import jax.numpy as jnp
from jax.experimental import pallas as pl
from jax.experimental.pallas import tpu as pltpu

H = 32           # hidden units (permuted axis)  -- must equal TOKENSIZE here
D_IN = 16        # input features
D_OUT = 8        # output features
TOKENSIZE = 32   # tokensize
N_PERM = 3       # permutation_number
WINDOWSIZE = 24  # windowsize


# --------------------------------------------------------------------------
# Fused Pallas kernel: 2 matmuls + 1 add + one dense (W, S*K) store
# --------------------------------------------------------------------------
def _augment_kernel(pb_ref, pf_ref, w1blk_ref, w2sel_ref, bsel_ref, out_ref,
                    *, k):
    w, sk = out_ref.shape          # (windowsize, samples*tokensize)
    h = w2sel_ref.shape[1]         # hidden units == one-hot class count

    # --- one-hot permutation selectors built in-kernel from int32 perms (VPU)
    # P_win[i, s*K+c] = 1  iff  perm_s[start+i] == c   (sentinel -1 rows -> 0)
    lane_in_blk = jax.lax.broadcasted_iota(jnp.int32, (w, sk), 1) & (k - 1)
    p_win = (pb_ref[...] == lane_in_blk).astype(jnp.float32)       # [W, S*K]
    # P^T[c, s*K+kpos] = 1  iff  perm_s[kpos] == c
    cls = jax.lax.broadcasted_iota(jnp.int32, (h, sk), 0)
    p_t = (pf_ref[...] == cls).astype(jnp.float32)                 # [H, S*K]

    # --- layer-1 window rows, all samples in one MXU pass (block-diag W1b)
    acc = jnp.dot(p_win, w1blk_ref[...], preferred_element_type=jnp.float32)
    # --- layer-2 window rows: window-selected W2 rows @ P^T  (+ bias tokens)
    acc += jnp.dot(w2sel_ref[...], p_t, preferred_element_type=jnp.float32)
    out_ref[...] = acc + bsel_ref[...]                             # single dense store


def _fused_augment(pb, pf, w1blk, w2sel, bsel, *, w, sk, k):
    kernel = functools.partial(_augment_kernel, k=k)
    return pl.pallas_call(
        kernel,
        out_shape=jax.ShapeDtypeStruct((w, sk), jnp.float32),
        grid=(1,),                                      # single fused step
        in_specs=[
            pl.BlockSpec(pb.shape, lambda i: (0, 0)),
            pl.BlockSpec(pf.shape, lambda i: (0, 0)),
            pl.BlockSpec(w1blk.shape, lambda i: (0, 0)),
            pl.BlockSpec(w2sel.shape, lambda i: (0, 0)),
            pl.BlockSpec(bsel.shape, lambda i: (0, 0)),
        ],
        out_specs=pl.BlockSpec((w, sk), lambda i: (0, 0)),
        compiler_params=pltpu.CompilerParams(
            dimension_semantics=("arbitrary",)),        # keep on one TC
    )(pb, pf, w1blk, w2sel, bsel)


# --------------------------------------------------------------------------
# Mask / position bookkeeping: depends only on shapes -> host-side constants
# --------------------------------------------------------------------------
def _token_mask_and_pos(h, d_in, d_out, tokensize):
    def layer(out_dim, row_len, layer_idx):
        n_chunks = -(-row_len // tokensize)
        mask = np.zeros((out_dim, n_chunks * tokensize), np.float32)
        mask[:, :row_len] = 1.0
        mask = mask.reshape(out_dim * n_chunks, tokensize)
        pos = np.stack([
            np.full((out_dim * n_chunks,), layer_idx, np.int32),
            np.repeat(np.arange(out_dim, dtype=np.int32), n_chunks),
            np.tile(np.arange(n_chunks, dtype=np.int32), out_dim),
        ], axis=1)
        return mask, pos

    m1, p1 = layer(h, d_in + 1, 0)
    m2, p2 = layer(d_out, h + 1, 1)
    return np.concatenate([m1, m2], 0), np.concatenate([p1, p2], 0)


# --------------------------------------------------------------------------
# Whole pipeline in one jit (idx_start is static -> all offsets fold away)
# --------------------------------------------------------------------------
@functools.partial(jax.jit, static_argnames=("idx_start",))
def _pipeline_core(w1, b1, w2, b2, perms, idx_start):
    h, d_in = w1.shape
    d_out = w2.shape[0]
    k = TOKENSIZE
    # Fused layout assumes 1 token / layer-0 neuron and exactly 2 / layer-1
    # neuron (chunk0 = permuted w2 row, chunk1 = bias token).
    assert h == k and d_in + 1 <= k and (k & (k - 1)) == 0

    s = perms.shape[0] + 1                 # base + N permuted samples
    t2 = 2 * d_out                         # layer-2 interleaved token rows
    t = h + t2                             # tokens per sample (48)
    w = min(WINDOWSIZE, t)

    start = int(min(max(int(idx_start), 0), t - w))   # static host-side clamp

    # ---- permutations as small int32 arrays (sample 0 = identity) ----
    perms_all = jnp.concatenate(
        [jnp.arange(h, dtype=perms.dtype)[None, :], perms], axis=0)   # [S, H]
    pf = perms_all.reshape(1, s * h).astype(jnp.int32)                # [1, S*K]

    # window rows of the layer-1 permutation, -1 sentinel outside layer 1
    cols = np.arange(w) + start
    valid1 = cols < h
    cols_c = np.clip(cols, 0, h - 1)
    pw = jnp.where(jnp.asarray(valid1)[None, :],
                   perms_all[:, jnp.asarray(cols_c)], -1)             # [S, W]
    pb = jnp.broadcast_to(pw.T.astype(jnp.int32)[:, :, None],
                          (w, s, k)).reshape(w, s * k)                # [W, S*K]

    # ---- trace-time folded weights ----
    w1b = jnp.concatenate([w1, b1[:, None]], axis=1)
    w1b_pad = jnp.pad(w1b, ((0, 0), (0, k - (d_in + 1))))             # [H, K]
    w1blk = jnp.kron(jnp.eye(s, dtype=jnp.float32), w1b_pad)          # [S*H, S*K]

    # layer-2 window rows, selection folded at trace time (exact, no XLA dot):
    #   even interleave row j  -> W2 row j//2 (to be column-permuted in-kernel)
    #   odd  interleave row j  -> bias token b2[j//2] (sample-independent)
    rows2 = np.arange(w) + start - h
    in_l2 = (rows2 >= 0) & (rows2 < t2)
    sel_w2 = in_l2 & (rows2 % 2 == 0)
    sel_b = in_l2 & (rows2 % 2 == 1)
    src = np.clip(rows2 // 2, 0, d_out - 1)
    w2sel = jnp.where(jnp.asarray(sel_w2)[:, None],
                      w2[jnp.asarray(src)], 0.0)                      # [W, H]
    bvals = jnp.where(jnp.asarray(sel_b), b2[jnp.asarray(src)], 0.0)  # [W]
    bsel = jnp.tile(
        jnp.zeros((w, k), jnp.float32).at[:, 0].set(bvals), (1, s))   # [W, S*K]

    # ---- fused kernel: lane-dense (W, S*K) output ----
    out_flat = _fused_augment(pb, pf, w1blk, w2sel, bsel,
                              w=w, sk=s * k, k=k)
    ddx = out_flat.reshape(w, s, k).transpose(1, 0, 2)                # [S, W, K]

    # ---- mask / position constants (shape-only, identical for all samples)
    mdx_full, pos_full = _token_mask_and_pos(h, d_in, d_out, k)
    mdx = jnp.asarray(mdx_full[start:start + w])
    pos = jnp.asarray(pos_full[start:start + w])
    return ddx, mdx, pos


def checkpoint_augmentation_pipeline(w1, b1, w2, b2, perms, idx_start,
                                     props=None):
    # NOTE: idx_start must be a concrete host Python int (it is a static jit
    # argument; at most ~t-w+1 distinct values -> bounded recompiles).
    ddx, mdx, pos = _pipeline_core(w1, b1, w2, b2, perms,
                                   idx_start=int(idx_start))
    return ddx, mdx, pos, props


# --------------------------------------------------------------------------
# Pure-JAX reference (gather-based) for correctness checking
# --------------------------------------------------------------------------
def _tokenize_rows(wb, tokensize):
    out_dim, row_len = wb.shape
    n_chunks = -(-row_len // tokensize)
    pad = n_chunks * tokensize - row_len
    return jnp.pad(wb, ((0, 0), (0, pad))).reshape(out_dim * n_chunks,
                                                   tokensize)


def _tokenize_ckpt(w1b, w2, b2, tokensize):
    t1 = _tokenize_rows(w1b, tokensize)
    t2 = _tokenize_rows(jnp.concatenate([w2, b2[:, None]], axis=1), tokensize)
    return jnp.concatenate([t1, t2], axis=0)


def reference_pipeline(w1, b1, w2, b2, perms, idx_start):
    w1b = jnp.concatenate([w1, b1[:, None]], axis=1)
    samples = [_tokenize_ckpt(w1b, w2, b2, TOKENSIZE)]
    for n in range(perms.shape[0]):
        samples.append(_tokenize_ckpt(w1b[perms[n], :], w2[:, perms[n]], b2,
                                      TOKENSIZE))
    ddx = jnp.stack(samples, axis=0)
    ws = min(WINDOWSIZE, ddx.shape[-2])
    return ddx[:, idx_start:idx_start + ws]


if __name__ == "__main__":
    random.seed(0)
    key = jax.random.PRNGKey(0)
    k1, k2, k3, k4, kp = jax.random.split(key, 5)

    # deterministic synthetic checkpoint (2-layer MLP)
    w1 = jax.random.normal(k1, (H, D_IN), jnp.float32)
    b1 = jax.random.normal(k2, (H,), jnp.float32)
    w2 = jax.random.normal(k3, (D_OUT, H), jnp.float32)
    b2 = jax.random.normal(k4, (D_OUT,), jnp.float32)
    props = jnp.arange(4, dtype=jnp.float32)

    # N random permutations of the hidden axis (torch.randperm analogue)
    perm_keys = jax.random.split(kp, N_PERM)
    perms = jnp.stack(
        [jax.random.permutation(k, H) for k in perm_keys]).astype(jnp.int32)

    # random window start (random.randint analogue), plus both static regimes
    max_len = H + 2 * D_OUT                 # 48 tokens
    win = min(WINDOWSIZE, max_len)
    idx_rand = random.randint(0, max_len - win)

    for idx_start in sorted({0, idx_rand, max_len - win}):
        ddx_w, mdx_w, pos_w, props_out = checkpoint_augmentation_pipeline(
            w1, b1, w2, b2, perms, idx_start, props)
        jax.block_until_ready((ddx_w, mdx_w, pos_w))

        ddx_r = reference_pipeline(w1, b1, w2, b2, perms, idx_start)
        assert ddx_w.shape == (N_PERM + 1, win, TOKENSIZE)
        assert mdx_w.shape == (win, TOKENSIZE)
        assert pos_w.shape == (win, 3)
        np.testing.assert_allclose(np.asarray(ddx_w), np.asarray(ddx_r),
                                   rtol=1e-6, atol=1e-6)

    print("KERNEL_OK")
</pallas_src>

<mosaic_0001>
module attributes {stable_mosaic.version = 11 : i64} {
  func.func @_augment_kernel(%arg0: i32, %arg1: memref<24x128xi32, #tpu.memory_space<vmem>>, %arg2: memref<1x128xi32, #tpu.memory_space<vmem>>, %arg3: memref<128x128xf32, #tpu.memory_space<vmem>>, %arg4: memref<24x32xf32, #tpu.memory_space<vmem>>, %arg5: memref<24x128xf32, #tpu.memory_space<vmem>>, %arg6: memref<24x128xf32, #tpu.memory_space<vmem>>) attributes {dimension_semantics = [#tpu.dimension_semantics<arbitrary>], iteration_bounds = array<i64: 1>, scalar_prefetch = 0 : i64, scratch_operands = 0 : i64, tpu.core_type = #tpu.core_type<tc>, window_params = [{pipeline_mode = #tpu.pipeline_mode<synchronous>, transform_indices = @transform_0, window_bounds = array<i64: 24, 128>}, {pipeline_mode = #tpu.pipeline_mode<synchronous>, transform_indices = @transform_1, window_bounds = array<i64: 1, 128>}, {pipeline_mode = #tpu.pipeline_mode<synchronous>, transform_indices = @transform_2, window_bounds = array<i64: 128, 128>}, {pipeline_mode = #tpu.pipeline_mode<synchronous>, transform_indices = @transform_3, window_bounds = array<i64: 24, 32>}, {pipeline_mode = #tpu.pipeline_mode<synchronous>, transform_indices = @transform_4, window_bounds = array<i64: 24, 128>}, {pipeline_mode = #tpu.pipeline_mode<synchronous>, transform_indices = @transform_5, window_bounds = array<i64: 24, 128>}]} {
    %0 = tpu.iota {dimensions = array<i32: 1>} : vector<24x128xi32>
    %c31_i32 = arith.constant 31 : i32
    %1 = vector.broadcast %c31_i32 : i32 to vector<24x128xi32>
    %2 = arith.andi %0, %1 : vector<24x128xi32>
    %c0 = arith.constant 0 : index
    %c0_0 = arith.constant 0 : index
    %3 = vector.load %arg1[%c0, %c0_0] : memref<24x128xi32, #tpu.memory_space<vmem>>, vector<24x128xi32>
    %4 = arith.cmpi eq, %3, %2 : vector<24x128xi32>
    %5 = arith.extui %4 : vector<24x128xi1> to vector<24x128xi32>
    %6 = arith.sitofp %5 : vector<24x128xi32> to vector<24x128xf32>
    %7 = tpu.iota {dimensions = array<i32: 0>} : vector<32x128xi32>
    %c0_1 = arith.constant 0 : index
    %c0_2 = arith.constant 0 : index
    %8 = vector.load %arg2[%c0_1, %c0_2] : memref<1x128xi32, #tpu.memory_space<vmem>>, vector<1x128xi32>
    %9 = vector.broadcast %8 : vector<1x128xi32> to vector<32x128xi32>
    %10 = arith.cmpi eq, %9, %7 : vector<32x128xi32>
    %11 = arith.extui %10 : vector<32x128xi1> to vector<32x128xi32>
    %12 = arith.sitofp %11 : vector<32x128xi32> to vector<32x128xf32>
    %c0_3 = arith.constant 0 : index
    %c0_4 = arith.constant 0 : index
    %13 = vector.load %arg3[%c0_3, %c0_4] : memref<128x128xf32, #tpu.memory_space<vmem>>, vector<128x128xf32>
    %cst = arith.constant dense<0.000000e+00> : vector<24x128xf32>
    %14 = tpu.matmul %6, %13, %cst {dimension_numbers = #tpu.dot_dimension_numbers<[1], [0], [0], [1], [0, 0, 1, 1], [], []>} : vector<24x128xf32>, vector<128x128xf32>, vector<24x128xf32> -> vector<24x128xf32>
    %c0_5 = arith.constant 0 : index
    %c0_6 = arith.constant 0 : index
    %15 = vector.load %arg4[%c0_5, %c0_6] : memref<24x32xf32, #tpu.memory_space<vmem>>, vector<24x32xf32>
    %cst_7 = arith.constant dense<0.000000e+00> : vector<24x128xf32>
    %16 = tpu.matmul %15, %12, %cst_7 {dimension_numbers = #tpu.dot_dimension_numbers<[1], [0], [0], [1], [0, 0, 1, 1], [], []>} : vector<24x32xf32>, vector<32x128xf32>, vector<24x128xf32> -> vector<24x128xf32>
    %17 = arith.addf %14, %16 : vector<24x128xf32>
    %c0_8 = arith.constant 0 : index
    %c0_9 = arith.constant 0 : index
    %18 = vector.load %arg5[%c0_8, %c0_9] : memref<24x128xf32, #tpu.memory_space<vmem>>, vector<24x128xf32>
    %19 = arith.addf %17, %18 : vector<24x128xf32>
    %c0_10 = arith.constant 0 : index
    %c0_11 = arith.constant 0 : index
    %20 = vector.load %arg6[%c0_10, %c0_11] : memref<24x128xf32, #tpu.memory_space<vmem>>, vector<24x128xf32>
    tpu.vector_store %arg6[%c0_10, %c0_11], %19 {strides = array<i32>} : memref<24x128xf32, #tpu.memory_space<vmem>>, vector<24x128xf32>,
    return
  }
  func.func @transform_0(%arg0: i32) -> (i32, i32) {
    %c0_i32 = arith.constant 0 : i32
    %c0_i32_0 = arith.constant 0 : i32
    %c0_i32_1 = arith.constant 0 : i32
    return %c0_i32, %c0_i32_0 : i32, i32
  }
  func.func @transform_1(%arg0: i32) -> (i32, i32) {
    %c0_i32 = arith.constant 0 : i32
    %c0_i32_0 = arith.constant 0 : i32
    %c0_i32_1 = arith.constant 0 : i32
    return %c0_i32, %c0_i32_0 : i32, i32
  }
  func.func @transform_2(%arg0: i32) -> (i32, i32) {
    %c0_i32 = arith.constant 0 : i32
    %c0_i32_0 = arith.constant 0 : i32
    %c0_i32_1 = arith.constant 0 : i32
    return %c0_i32, %c0_i32_0 : i32, i32
  }
  func.func @transform_3(%arg0: i32) -> (i32, i32) {
    %c0_i32 = arith.constant 0 : i32
    %c0_i32_0 = arith.constant 0 : i32
    %c0_i32_1 = arith.constant 0 : i32
    return %c0_i32, %c0_i32_0 : i32, i32
  }
  func.func @transform_4(%arg0: i32) -> (i32, i32) {
    %c0_i32 = arith.constant 0 : i32
    %c0_i32_0 = arith.constant 0 : i32
    %c0_i32_1 = arith.constant 0 : i32
    return %c0_i32, %c0_i32_0 : i32, i32
  }
  func.func @transform_5(%arg0: i32) -> (i32, i32) {
    %c0_i32 = arith.constant 0 : i32
    %c0_i32_0 = arith.constant 0 : i32
    %c0_i32_1 = arith.constant 0 : i32
    return %c0_i32, %c0_i32_0 : i32, i32
  }
}

</mosaic_0001>

<bundles_post_ra>
// kernel: _pipeline_core.1
= control target key start
LH: loop header
LB: loop body
LE: loop exit
PB: predicated region body
PF: predicated region fallthrough
CT: control target
= control target key end

     0   :  { %v20_v0 = vlaneseq  ;;  %v396_v1 = vmov 0.0|0.0   ;;  %vm397_vm0 = vmmov 0   ;;  %v398_v8 = vmov 0.0   ;;  %s545_s2 = inlined_call_operand.vmem [shape: f32[128,128], index: 2, kind: input, shape index: {}]   ;;  %s546_s1 = inlined_call_operand.vmem [shape: s32[1,128], index: 1, kind: input, shape index: {}]   ;;  %s547_s3 = inlined_call_operand.vmem [shape: f32[24,32], index: 3, kind: input, shape index: {}]   ;;  %s548_s0 = inlined_call_operand.vmem [shape: s32[24,128], index: 0, kind: input, shape index: {}]   ;;  %s549_s4 = inlined_call_operand.vmem [shape: f32[24,128], index: 4, kind: input, shape index: {}]   ;;  %s550_s5 = inlined_call_operand.vmem [shape: f32[24,128], index: 5, kind: output, shape index: {}]  }
   0x1   :  { %367 = vmatprep.subr.bf16.mxu1 %v396_v1  ;;  %v57_v2 = vld [vmem:[%s545_s2] sm:$0xff]  ;;  %v58_v3 = vld [vmem:[%s545_s2 + $0x8] sm:$0xff]  ;;  %v59_v4 = vld [vmem:[%s545_s2 + $0x10] sm:$0xff]  ;;  %361 = vmatprep.subr.bf16.mxu0 %v396_v1  ;;  %v399_v17 = vmov 1.0|1.0   ;;  %vm76_vm7 = vcmask 261120  }
   0x2   :  { %v368_v5 = vpack.c.bf16 %v58_v3, %v57_v2  ;;  %v60_v6 = vld [vmem:[%s545_s2 + $0x18] sm:$0xff]  ;;  %v36_v7 = vshrl.u32 %v20_v0, 7  ;;  %311 = vmatprep.mubr.msk.f32.mxu0 %vm397_vm0, %v398_v8  ;;  %352 = vmatprep.mubr.msk.f32.mxu1 %vm397_vm0, %v398_v8  ;;  %v61_v13 = vld [vmem:[%s545_s2 + $0x20] sm:$0xff]  ;;  %v62_v14 = vld [vmem:[%s545_s2 + $0x28] sm:$0xff]  ;;  %v21_v33 = vand.u32 127, %v20_v0  ;;  %v400_v40 = vmov 1.0  }
   0x3   :  { %v371_v9 = vpack.c.bf16 %v60_v6, %v59_v4  ;;  %v262_v15 = vld [vmem:[%s546_s1] ss:$0 sm:$0xff]  ;;  %v374_v16 = vpack.c.bf16 %v62_v14, %v61_v13  ;;  %v63_v18 = vld [vmem:[%s545_s2 + $0x30] sm:$0xff]  ;;  %v64_v19 = vld [vmem:[%s545_s2 + $0x38] sm:$0xff] }
   0x4   :  { %369 = vmatpush3.bf16.msra.mxu1 %v368_v5  ;;  %v37_v10 = vadd.s32 8, %v36_v7  ;;  %v38_v11 = vadd.s32 16, %v36_v7  ;;  %v39_v12 = vadd.s32 24, %v36_v7  ;;  %vm45_vm1 = vcmp.eq.s32.totalorder %v262_v15, %v36_v7  ;;  %v73_v21 = vld [vmem:[%s547_s3] sm:$0xff]  ;;  %v66_v23 = vld [vmem:[%s545_s2 + $0x48] sm:$0xff]  ;;  %v67_v26 = vld [vmem:[%s545_s2 + $0x50] sm:$0xff] }
   0x5   :  { %370 = vmatprep.subr.bf16.mxu1 %v396_v1  ;;  %v377_v20 = vpack.c.bf16 %v64_v19, %v63_v18  ;;  %v65_v22 = vld [vmem:[%s545_s2 + $0x40] sm:$0xff]  ;;  %v74_v25 = vld [vmem:[%s547_s3 + $0x8] sm:$0xff]  ;;  %v68_v27 = vld [vmem:[%s545_s2 + $0x58] sm:$0xff]  ;;  %v22_v37 = vand.u32 31, %v21_v33 }
   0x6   :  { %vm46_vm2 = vcmp.eq.s32.totalorder %v262_v15, %v37_v10  ;;  %vm47_vm3 = vcmp.eq.s32.totalorder %v262_v15, %v38_v11  ;;  %vm48_vm5 = vcmp.eq.s32.totalorder %v262_v15, %v39_v12  ;;  %v380_v24 = vpack.c.bf16 %v66_v23, %v65_v22  ;;  %v75_v29 = vld [vmem:[%s547_s3 + $0x10] sm:$0xff]  ;;  %v69_v30 = vld [vmem:[%s545_s2 + $0x60] sm:$0xff]  ;;  %v70_v31 = vld [vmem:[%s545_s2 + $0x68] sm:$0xff] }
   0x7   :  { %vm362_vm4 = vmpackc.low %vm46_vm2, %vm45_vm1  ;;  %v383_v28 = vpack.c.bf16 %v68_v27, %v67_v26  ;;  %v386_v32 = vpack.c.bf16 %v70_v31, %v69_v30  ;;  %v71_v34 = vld [vmem:[%s545_s2 + $0x70] sm:$0xff]  ;;  %v72_v35 = vld [vmem:[%s545_s2 + $0x78] sm:$0xff] }
   0x8   :  { %372 = vmatpush3.bf16.msra.mxu1 %v371_v9  ;;  %363 = vmatpush3.bf16.msk.msra.mxu0 %vm362_vm4, %v399_v17  ;;  %vm365_vm6 = vmpackc.low %vm48_vm5, %vm47_vm3  ;;  %v389_v36 = vpack.c.bf16 %v72_v35, %v71_v34  ;;  %v23_v38 = vld [vmem:[%s548_s0] sm:$0xff]  ;;  %v24_v39 = vld [vmem:[%s548_s0 + $0x8] sm:$0xff] }
   0x9   :  { %373 = vmatprep.subr.bf16.mxu1 %v396_v1  ;;  %364 = vmatprep.subr.bf16.mxu0 %v396_v1  ;;  %vm26_vm8 = vcmp.eq.s32.totalorder %v23_v38, %v22_v37  ;;  %vm27_vm9 = vcmp.eq.s32.totalorder %v24_v39, %v22_v37  ;;  %v25_v41 = vld [vmem:[%s548_s0 + $0x10] sm:$0xff]  ;;  %v246_v49 = vld [vmem:[%s549_s4] sm:$0xff]  ;;  %v247_v54 = vld [vmem:[%s549_s4 + $0x8] sm:$0xff] }
   0xa   :  { %vm28_vm10 = vcmp.eq.s32.totalorder %v25_v41, %v22_v37  ;;  %v248_v59 = vld [vmem:[%s549_s4 + $0x10] sm:$0xff] }
   0xc   :  { %375 = vmatpush3.bf16.msra.mxu1 %v374_v16  ;;  %366 = vmatpush3.bf16.msk.msra.mxu0 %vm365_vm6, %v399_v17 }
   0xd   :  { %376 = vmatprep.subr.bf16.mxu1 %v396_v1 }
   0xf   :  { %312 = vmatmul.mubr.msk.f32.vlgmr.msra.gmra.mrb[0].mxu0 %vm76_vm7, %v73_v21 }
  0x10   :  { %378 = vmatpush3.bf16.msra.mxu1 %v377_v20  ;;  %314 = vmatprep.mubr.msk.f32.mxu0 %vm397_vm0, %v398_v8 }
  0x11   :  { %379 = vmatprep.subr.bf16.mxu1 %v396_v1 }
  0x13   :  { %315 = vmatmul.mubr.msk.f32.gmra.mrb[2].mxu0 %vm76_vm7, %v74_v25 }
  0x14   :  { %381 = vmatpush3.bf16.msra.mxu1 %v380_v24  ;;  %317 = vmatprep.mubr.msk.f32.mxu0 %vm397_vm0, %v398_v8 }
  0x15   :  { %382 = vmatprep.subr.bf16.mxu1 %v396_v1 }
  0x17   :  { %318 = vmatmul.mubr.msk.f32.gmra.mrb[4].mxu0 %vm76_vm7, %v75_v29 }
  0x18   :  { %384 = vmatpush3.bf16.msra.mxu1 %v383_v28 }
  0x19   :  { %385 = vmatprep.subr.bf16.mxu1 %v396_v1 }
  0x1c   :  { %387 = vmatpush3.bf16.msra.mxu1 %v386_v32 }
  0x1d   :  { %388 = vmatprep.subr.bf16.mxu1 %v396_v1 }
  0x20   :  { %390 = vmatpush3.bf16.msra.mxu1 %v389_v36 }
  0x23   :  { %353 = vmatmul.mubr.msk.f32.vlgmr.msra.gmra.mrb[0].mxu1 %vm26_vm8, %v400_v40 }
  0x24   :  { %355 = vmatprep.mubr.msk.f32.mxu1 %vm397_vm0, %v398_v8 }
  0x27   :  { %356 = vmatmul.mubr.msk.f32.gmra.mrb[2].mxu1 %vm27_vm9, %v400_v40 }
  0x28   :  { %358 = vmatprep.mubr.msk.f32.mxu1 %vm397_vm0, %v398_v8 }
  0x2b   :  { %359 = vmatmul.mubr.msk.f32.gmra.mrb[4].mxu1 %vm28_vm10, %v400_v40 }
  0xe2   :  { %v152_v42 = vpop.f32.mrb[0].mxu0 }
  0xe3   :  { %v313_v43 = vpop.f32.mrb[1].mxu0 }
  0xe6   :  { %v157_v44 = vpop.f32.mrb[2].mxu0 }
  0xe7   :  { %v316_v45 = vpop.f32.mrb[3].mxu0 }
  0xea   :  { %v162_v46 = vpop.f32.mrb[4].mxu0 }
  0xeb   :  { %v319_v47 = vpop.f32.mrb[5].mxu0 }
  0xf6   :  { %v232_v48 = vpop.f32.mrb[0].mxu1 }
  0xf7   :  { %v233_v50 = vadd.f32 %v232_v48, %v152_v42  ;;  %v354_v51 = vpop.f32.mrb[1].mxu1 }
  0xf9   :  { %v249_v52 = vadd.f32 %v246_v49, %v233_v50 }
  0xfa   :  { %v237_v53 = vpop.f32.mrb[2].mxu1 }
  0xfb   :  { %252 = vst [vmem:[%s550_s5] sm:$0xff] %v249_v52  ;;  %v238_v55 = vadd.f32 %v237_v53, %v157_v44  ;;  %v357_v56 = vpop.f32.mrb[3].mxu1 }
  0xfd   :  { %v250_v57 = vadd.f32 %v247_v54, %v238_v55 }
  0xfe   :  { %v242_v58 = vpop.f32.mrb[4].mxu1 }
  0xff   :  { %253 = vst [vmem:[%s550_s5 + $0x8] sm:$0xff] %v250_v57  ;;  %v243_v60 = vadd.f32 %v242_v58, %v162_v46  ;;  %v360_v61 = vpop.f32.mrb[5].mxu1 }
 0x101   :  { %v251_v62 = vadd.f32 %v248_v59, %v243_v60 }
 0x103   :  { %254 = vst [vmem:[%s550_s5 + $0x10] sm:$0xff] %v251_v62 }

</bundles_post_ra>
